<compile_context>
chip_gen: v5e
topology: v5e:2x2
jax: 0.10.0
libtpu: 0.0.40
codegen_flags: <defaults>
</compile_context>

<pallas_src>
import functools

import jax
import jax.numpy as jnp
from jax import lax
from jax.experimental import pallas as pl
from jax.experimental.pallas import tpu as pltpu


def _round_up(x: int, m: int) -> int:
    return (x + m - 1) // m * m


def bmm_transposed_kernel(x1_ref, x2_ref, o_ref, acc_ref):
    # Per grid step (batch dim squeezed out):
    #   x1_ref: (tm, tn), x2_ref: (tm, tk), o_ref: (tk, tn), acc_ref: (tk, tn) f32
    # Grid = (B, K_blocks, N_blocks, M_blocks); axis 3 (M) is the reduction.
    @pl.when(pl.program_id(3) == 0)
    def _():
        acc_ref[...] = jnp.zeros_like(acc_ref)

    # Transposed contraction directly on the MXU: contract dim 0 of both tiles,
    # (tm, tk) x (tm, tn) -> (tk, tn), accumulate in f32. No x2.T materialization.
    acc_ref[...] += lax.dot_general(
        x2_ref[...],
        x1_ref[...],
        dimension_numbers=(((0,), (0,)), ((), ())),
        preferred_element_type=jnp.float32,
    )

    @pl.when(pl.program_id(3) == pl.num_programs(3) - 1)
    def _():
        o_ref[...] = acc_ref[...].astype(o_ref.dtype)


@functools.partial(jax.jit, static_argnames=("tm_target", "tk_target", "tn_target"))
def bmm_transposed(x1, x2, *, tm_target=512, tk_target=256, tn_target=256):
    """Computes torch.bmm(x2.permute(0, 2, 1), x1) with a tiled Pallas TPU kernel."""
    B, M, N = x1.shape
    B2, M2, K = x2.shape
    assert B == B2 and M == M2, "batch / contraction dims must match"
    out_dtype = x1.dtype

    # Tile sizes: sublane-aligned (8) on the reduction dim M, lane-aligned (128)
    # on the K / N dims so output stores are unmasked. Small dims collapse to a
    # single full-extent (padded) tile.
    tm = min(tm_target, _round_up(M, 8))
    tk = min(tk_target, _round_up(K, 128))
    tn = min(tn_target, _round_up(N, 128))

    Mp = _round_up(M, tm)
    Kp = _round_up(K, tk)
    Np = _round_up(N, tn)

    # Zero-pad to tile multiples (zeros in the M (contraction) dim contribute
    # nothing; padded K/N rows/cols are sliced off afterwards).
    if (Mp, Np) != (M, N):
        x1 = jnp.pad(x1, ((0, 0), (0, Mp - M), (0, Np - N)))
    if (Mp, Kp) != (M, K):
        x2 = jnp.pad(x2, ((0, 0), (0, Mp - M), (0, Kp - K)))

    grid = (B, Kp // tk, Np // tn, Mp // tm)

    itemsize = jnp.dtype(out_dtype).itemsize
    cost = pl.CostEstimate(
        flops=2 * B * Mp * Np * Kp,
        transcendentals=0,
        bytes_accessed=(x1.size + x2.size + B * Kp * Np) * itemsize,
    )

    out = pl.pallas_call(
        bmm_transposed_kernel,
        out_shape=jax.ShapeDtypeStruct((B, Kp, Np), out_dtype),
        grid_spec=pltpu.PrefetchScalarGridSpec(
            num_scalar_prefetch=0,
            grid=grid,
            in_specs=[
                # x1: (B, Mp, Np), block (tm, tn), batch dim squeezed
                pl.BlockSpec((None, tm, tn), lambda b, k, n, m: (b, m, n)),
                # x2: (B, Mp, Kp), block (tm, tk)
                pl.BlockSpec((None, tm, tk), lambda b, k, n, m: (b, m, k)),
            ],
            # Output block stays fixed across the reduction axis m (accumulator).
            out_specs=pl.BlockSpec((None, tk, tn), lambda b, k, n, m: (b, k, n)),
            scratch_shapes=[pltpu.VMEM((tk, tn), jnp.float32)],
        ),
        compiler_params=pltpu.CompilerParams(
            dimension_semantics=("parallel", "parallel", "parallel", "arbitrary"),
            vmem_limit_bytes=32 * 1024 * 1024,
        ),
        cost_estimate=cost,
    )(x1, x2)

    if (Kp, Np) != (K, N):
        out = out[:, :K, :N]
    return out


if __name__ == "__main__":
    key = jax.random.PRNGKey(0)

    # Small shapes consistent with the module's bmm(permute(x2), x1) forward.
    B, M, N, K = 2, 8, 16, 16
    k1, k2, k3, k4 = jax.random.split(key, 4)
    x1 = jax.random.normal(k1, (B, M, N), dtype=jnp.float32)
    x2 = jax.random.normal(k2, (B, M, K), dtype=jnp.float32)

    out = jax.block_until_ready(bmm_transposed(x1, x2))
    ref = jnp.einsum("bmk,bmn->bkn", x2, x1)
    assert out.shape == (B, K, N)
    assert jnp.allclose(out, ref, atol=1e-5, rtol=1e-5)

    # Also exercise the exact shapes from the original PyTorch spec: (1, 2, 2).
    y1 = jax.random.normal(k3, (1, 2, 2), dtype=jnp.float32)
    y2 = jax.random.normal(k4, (1, 2, 2), dtype=jnp.float32)
    out2 = jax.block_until_ready(bmm_transposed(y1, y2))
    ref2 = jnp.einsum("bmk,bmn->bkn", y2, y1)
    assert out2.shape == (1, 2, 2)
    assert jnp.allclose(out2, ref2, atol=1e-5, rtol=1e-5)

    print("KERNEL_OK")
</pallas_src>

<mosaic_0001>
module attributes {stable_mosaic.version = 11 : i64} {
  func.func @bmm_transposed_kernel(%arg0: i32, %arg1: i32, %arg2: i32, %arg3: i32, %arg4: memref<1x8x128xf32, #tpu.memory_space<vmem>>, %arg5: memref<1x8x128xf32, #tpu.memory_space<vmem>>, %arg6: memref<1x128x128xf32, #tpu.memory_space<vmem>>, %arg7: memref<128x128xf32, #tpu.memory_space<vmem>>) attributes {dimension_semantics = [#tpu.dimension_semantics<parallel>, #tpu.dimension_semantics<parallel>, #tpu.dimension_semantics<parallel>, #tpu.dimension_semantics<arbitrary>], iteration_bounds = array<i64: 2, 1, 1, 1>, scalar_prefetch = 0 : i64, scratch_operands = 1 : i64, tpu.core_type = #tpu.core_type<tc>, window_params = [{transform_indices = @transform_0, window_bounds = array<i64: 1, 8, 128>}, {transform_indices = @transform_1, window_bounds = array<i64: 1, 8, 128>}, {transform_indices = @transform_2, window_bounds = array<i64: 1, 128, 128>}]} {
    %c0_i32 = arith.constant 0 : i32
    %0 = arith.cmpi eq, %arg3, %c0_i32 : i32
    %1 = arith.extui %0 : i1 to i32
    %c0_i32_0 = arith.constant 0 : i32
    %2 = arith.cmpi ne, %1, %c0_i32_0 : i32
    scf.if %2 {
      %cst_12 = arith.constant 0.000000e+00 : f32
      %14 = vector.broadcast %cst_12 : f32 to vector<128x128xf32>
      %c0_13 = arith.constant 0 : index
      %c0_14 = arith.constant 0 : index
      %15 = vector.load %arg7[%c0_13, %c0_14] : memref<128x128xf32, #tpu.memory_space<vmem>>, vector<128x128xf32>
      tpu.vector_store %arg7[%c0_13, %c0_14], %14 {strides = array<i32>} : memref<128x128xf32, #tpu.memory_space<vmem>>, vector<128x128xf32>,
    } else {
    }
    %c0 = arith.constant 0 : index
    %c0_1 = arith.constant 0 : index
    %3 = vector.load %arg7[%c0, %c0_1] : memref<128x128xf32, #tpu.memory_space<vmem>>, vector<128x128xf32>
    %c0_2 = arith.constant 0 : index
    %c0_3 = arith.constant 0 : index
    %c0_4 = arith.constant 0 : index
    %4 = vector.load %arg5[%c0_2, %c0_3, %c0_4] : memref<1x8x128xf32, #tpu.memory_space<vmem>>, vector<1x8x128xf32>
    %5 = vector.shape_cast %4 : vector<1x8x128xf32> to vector<8x128xf32>
    %c0_5 = arith.constant 0 : index
    %c0_6 = arith.constant 0 : index
    %c0_7 = arith.constant 0 : index
    %6 = vector.load %arg4[%c0_5, %c0_6, %c0_7] : memref<1x8x128xf32, #tpu.memory_space<vmem>>, vector<1x8x128xf32>
    %7 = vector.shape_cast %6 : vector<1x8x128xf32> to vector<8x128xf32>
    %cst = arith.constant dense<0.000000e+00> : vector<128x128xf32>
    %8 = tpu.matmul %5, %7, %cst {dimension_numbers = #tpu.dot_dimension_numbers<[0], [0], [1], [1], [0, 1, 1, 1], [], []>} : vector<8x128xf32>, vector<8x128xf32>, vector<128x128xf32> -> vector<128x128xf32>
    %9 = arith.addf %3, %8 : vector<128x128xf32>
    %c0_8 = arith.constant 0 : index
    %c0_9 = arith.constant 0 : index
    %10 = vector.load %arg7[%c0_8, %c0_9] : memref<128x128xf32, #tpu.memory_space<vmem>>, vector<128x128xf32>
    tpu.vector_store %arg7[%c0_8, %c0_9], %9 {strides = array<i32>} : memref<128x128xf32, #tpu.memory_space<vmem>>, vector<128x128xf32>,
    %c0_i32_10 = arith.constant 0 : i32
    %11 = arith.cmpi eq, %arg3, %c0_i32_10 : i32
    %12 = arith.extui %11 : i1 to i32
    %c0_i32_11 = arith.constant 0 : i32
    %13 = arith.cmpi ne, %12, %c0_i32_11 : i32
    scf.if %13 {
      %c0_12 = arith.constant 0 : index
      %c0_13 = arith.constant 0 : index
      %14 = vector.load %arg7[%c0_12, %c0_13] : memref<128x128xf32, #tpu.memory_space<vmem>>, vector<128x128xf32>
      %c0_14 = arith.constant 0 : index
      %c0_15 = arith.constant 0 : index
      %c0_16 = arith.constant 0 : index
      %15 = vector.load %arg6[%c0_14, %c0_15, %c0_16] : memref<1x128x128xf32, #tpu.memory_space<vmem>>, vector<1x128x128xf32>
      %16 = vector.shape_cast %15 : vector<1x128x128xf32> to vector<128x128xf32>
      %17 = vector.shape_cast %14 : vector<128x128xf32> to vector<1x128x128xf32>
      tpu.vector_store %arg6[%c0_14, %c0_15, %c0_16], %17 {strides = array<i32>} : memref<1x128x128xf32, #tpu.memory_space<vmem>>, vector<1x128x128xf32>,
    } else {
    }
    return
  }
  func.func @transform_0(%arg0: i32, %arg1: i32, %arg2: i32, %arg3: i32) -> (i32, i32, i32) {
    %c0_i32 = arith.constant 0 : i32
    return %arg0, %arg3, %arg2 : i32, i32, i32
  }
  func.func @transform_1(%arg0: i32, %arg1: i32, %arg2: i32, %arg3: i32) -> (i32, i32, i32) {
    %c0_i32 = arith.constant 0 : i32
    return %arg0, %arg3, %arg1 : i32, i32, i32
  }
  func.func @transform_2(%arg0: i32, %arg1: i32, %arg2: i32, %arg3: i32) -> (i32, i32, i32) {
    %c0_i32 = arith.constant 0 : i32
    return %arg0, %arg1, %arg2 : i32, i32, i32
  }
}

</mosaic_0001>

<bundles_post_ra>
// kernel: bmm_transposed.1
= control target key start
LH: loop header
LB: loop body
LE: loop exit
PB: predicated region body
PF: predicated region fallthrough
CT: control target
= control target key end

     0   :  { %s714_s9 = smov 0   ;;  %s716_s10 = smov 0   ;;  %s788_s0 = inlined_call_operand.vmem [shape: f32[2,8,128], index: 0, kind: input, shape index: {}]   ;;  %s789_s1 = inlined_call_operand.vmem [shape: f32[2,8,128], index: 1, kind: input, shape index: {}]   ;;  %s790_s2 = inlined_call_operand.vmem [shape: f32[2,128,128], index: 2, kind: output, shape index: {}]  }
   0x1   :  { %s718_s11 = smov 0  }
   0x2 LB: > { %s38_s12 = sadd.s32 1, %s693_s10  ;;  %p623_p0 = scmp.ge.s32.totalorder %s697_s11, 1  ;;  %s697_s11 = sphi %s718_s11, %s12_s11   ;;  %s693_s10 = sphi %s716_s10, %s792_s10   ;;  %s689_s9 = sphi %s714_s9, %s791_s9  }
   0x3   : > { %p40_p1 = scmp.ge.s32.totalorder %s38_s12, 2  ;;  %p170_p2 = scmp.lt.s32.totalorder %s697_s11, 3 }
   0x5   : > { %s794_s12 = smov (%p40_p1, %s38_s12), 0  ;;  %p171_p3 = pnand %p623_p0, %p170_p2 }
   0x6   : > { %p214_p4 = scmp.lt.s32.totalorder (!%p171_p3), %s689_s9, 1 }
   0x7   : > { %174 = sbr.rel (%p171_p3) target bundleno = 434 (0x1b2), region = 28 }
   0xc   : > { %s796_s9 = smov (!%p214_p4, %s689_s9), 1  ;;  %vm317_vm0 = vcmask 64512  }
   0xd   : > { %s624_s13 = sshll.u32 %s796_s9, 3  ;;  %s646_s20 = sshll.u32 %s796_s9, 7 }
   0xe   : > { %s233_s16 = scalar_lea.vmem %s789_s1, %s624_s13  ;;  %s223_s19 = scalar_lea.vmem %s788_s0, %s624_s13 }
   0xf   : > { %v283_v0 = vld [vmem:[%s233_s16] sm:$0xff]  ;;  %s761_s23 = scalar_lea.vmem %s790_s2, %s646_s20 }
  0x10   : > { %285 = vxpose.xlu0.b32.start.end [1/1] (short) %v283_v0, 128  ;;  %v284_v1 = vld [vmem:[%s223_s19] sm:$0xff] }
  0x11   : > { %381 = vmatpush.msra.mxu0 %v284_v1  ;;  %647 = vmatpush.msra.mxu1 %v284_v1 }
  0x12   : > { %648 = vmatpush.msra.mxu2 %v284_v1  ;;  %649 = vmatpush.msra.mxu3 %v284_v1 }
  0xb4   : > { %v301_v2 = vpop.trf.xlu0 }
  0xb5   : > { %628 = vmatmul.msk.f32.vlgmr.msra.gmra.mxu0 %vm317_vm0, %v301_v2 }
  0xbc   : > { %v302_v3 = vpop.trf.xlu0 }
  0xbd   : > { %629 = vmatmul.msk.f32.gmra.mxu0 %vm317_vm0, %v302_v3 }
  0xc4   : > { %v303_v4 = vpop.trf.xlu0 }
  0xc5   : > { %630 = vmatmul.msk.f32.gmra.mxu0 %vm317_vm0, %v303_v4 }
  0xcc   : > { %v304_v5 = vpop.trf.xlu0 }
  0xcd   : > { %631 = vmatmul.msk.f32.gmra.mxu0 %vm317_vm0, %v304_v5 }
  0xd4   : > { %v305_v6 = vpop.trf.xlu0 }
  0xd5   : > { %632 = vmatmul.msk.f32.vlgmr.msra.gmra.mxu1 %vm317_vm0, %v305_v6 }
  0xdc   : > { %v306_v7 = vpop.trf.xlu0 }
  0xdd   : > { %633 = vmatmul.msk.f32.gmra.mxu1 %vm317_vm0, %v306_v7 }
  0xe4   : > { %v307_v8 = vpop.trf.xlu0 }
  0xe5   : > { %634 = vmatmul.msk.f32.gmra.mxu1 %vm317_vm0, %v307_v8 }
  0xec   : > { %v308_v9 = vpop.trf.xlu0 }
  0xed   : > { %635 = vmatmul.msk.f32.gmra.mxu1 %vm317_vm0, %v308_v9 }
  0xf4   : > { %v309_v10 = vpop.trf.xlu0 }
  0xf5   : > { %636 = vmatmul.msk.f32.vlgmr.msra.gmra.mxu2 %vm317_vm0, %v309_v10 }
  0xfc   : > { %v310_v11 = vpop.trf.xlu0 }
  0xfd   : > { %637 = vmatmul.msk.f32.gmra.mxu2 %vm317_vm0, %v310_v11 }
 0x104   : > { %v311_v12 = vpop.trf.xlu0 }
 0x105   : > { %638 = vmatmul.msk.f32.gmra.mxu2 %vm317_vm0, %v311_v12 }
 0x10c   : > { %v312_v13 = vpop.trf.xlu0 }
 0x10d   : > { %639 = vmatmul.msk.f32.gmra.mxu2 %vm317_vm0, %v312_v13 }
 0x114   : > { %v313_v14 = vpop.trf.xlu0 }
 0x115   : > { %640 = vmatmul.msk.f32.vlgmr.msra.gmra.mxu3 %vm317_vm0, %v313_v14 }
 0x11c   : > { %v314_v15 = vpop.trf.xlu0 }
 0x11d   : > { %641 = vmatmul.msk.f32.gmra.mxu3 %vm317_vm0, %v314_v15 }
 0x124   : > { %v315_v16 = vpop.trf.xlu0 }
 0x125   : > { %642 = vmatmul.msk.f32.gmra.mxu3 %vm317_vm0, %v315_v16 }
 0x12c   : > { %v316_v17 = vpop.trf.xlu0 }
 0x12d   : > { %643 = vmatmul.msk.f32.gmra.mxu3 %vm317_vm0, %v316_v17 }
 0x132   : > { %v383_v18 = vpop.f32.mrf.mxu0 }
 0x133   : > { %482 = vst [vmem:[%s761_s23] sm:$0xff] %v383_v18 }
 0x13a   : > { %v386_v19 = vpop.f32.mrf.mxu0 }
 0x13b   : > { %483 = vst [vmem:[%s761_s23 + $0x8] sm:$0xff] %v386_v19 }
 0x142   : > { %v389_v20 = vpop.f32.mrf.mxu0 }
 0x143   : > { %484 = vst [vmem:[%s761_s23 + $0x10] sm:$0xff] %v389_v20 }
 0x14a   : > { %v392_v21 = vpop.f32.mrf.mxu0 }
 0x14b   : > { %485 = vst [vmem:[%s761_s23 + $0x18] sm:$0xff] %v392_v21 }
 0x152   : > { %v395_v22 = vpop.f32.mrf.mxu1 }
 0x153   : > { %486 = vst [vmem:[%s761_s23 + $0x20] sm:$0xff] %v395_v22 }
 0x15a   : > { %v398_v23 = vpop.f32.mrf.mxu1 }
 0x15b   : > { %487 = vst [vmem:[%s761_s23 + $0x28] sm:$0xff] %v398_v23 }
 0x162   : > { %v401_v24 = vpop.f32.mrf.mxu1 }
 0x163   : > { %488 = vst [vmem:[%s761_s23 + $0x30] sm:$0xff] %v401_v24 }
 0x16a   : > { %v404_v25 = vpop.f32.mrf.mxu1 }
 0x16b   : > { %489 = vst [vmem:[%s761_s23 + $0x38] sm:$0xff] %v404_v25 }
 0x178   : > { %v407_v26 = vpop.f32.mrf.mxu2 }
 0x179   : > { %490 = vst [vmem:[%s761_s23 + $0x40] sm:$0xff] %v407_v26 }
 0x180   : > { %v410_v27 = vpop.f32.mrf.mxu2 }
 0x181   : > { %491 = vst [vmem:[%s761_s23 + $0x48] sm:$0xff] %v410_v27 }
 0x188   : > { %v413_v28 = vpop.f32.mrf.mxu2 }
 0x189   : > { %492 = vst [vmem:[%s761_s23 + $0x50] sm:$0xff] %v413_v28 }
 0x190   : > { %v416_v29 = vpop.f32.mrf.mxu2 }
 0x191   : > { %493 = vst [vmem:[%s761_s23 + $0x58] sm:$0xff] %v416_v29 }
 0x198   : > { %v419_v30 = vpop.f32.mrf.mxu3 }
 0x199   : > { %494 = vst [vmem:[%s761_s23 + $0x60] sm:$0xff] %v419_v30 }
 0x1a0   : > { %v422_v31 = vpop.f32.mrf.mxu3 }
 0x1a1   : > { %495 = vst [vmem:[%s761_s23 + $0x68] sm:$0xff] %v422_v31 }
 0x1a8   : > { %v425_v32 = vpop.f32.mrf.mxu3 }
 0x1a9   : > { %496 = vst [vmem:[%s761_s23 + $0x70] sm:$0xff] %v425_v32 }
 0x1b0   : > { %v428_v33 = vpop.f32.mrf.mxu3 }
 0x1b1   : > { %497 = vst [vmem:[%s761_s23 + $0x78] sm:$0xff] %v428_v33 }
 0x1b2 PF: > { %s12_s11 = sadd.s32 1, %s697_s11   ;;  %s791_s9 = smov %s693_s10 }
 0x1b3   : > { %p9_p5 = scmp.ge.s32.totalorder %s12_s11, 4   ;;  %s792_s10 = smov %s794_s12 }
 0x1b5   :  { %11 = sbr.rel (!%p9_p5) target bundleno = 2 (0x2), region = 69 }

</bundles_post_ra>
